<compile_context>
chip_gen: v7x
topology: tpu7x:2x2x1
jax: 0.10.0
libtpu: 0.0.40
codegen_flags: <defaults>
</compile_context>

<pallas_src>
import jax
import jax.numpy as jnp
from jax.experimental import pallas as pl
from jax.experimental.pallas import tpu as pltpu


def count_head_kernel(x_ref, w1_ref, b1_ref, w2_ref, b2_ref, w3_ref,
                      o_ref, acc_ref):
    # x_ref : (RT, TK) f32 (cast to bf16 at the MXU)   w1_ref: (TK, F) bf16
    # b1_ref: (1, F) f32                               w2_ref: (F, F)  bf16
    # b2_ref: (1, F) f32                               w3_ref: (1, F)  f32
    # o_ref : (RT, 1) f32        acc_ref: (RT, F) f32 scratch (layer-1 accum)
    k = pl.program_id(1)

    @pl.when(k == 0)
    def _init():
        # Fold b1 into the accumulator init (saves a (RT, F) add in finalize).
        acc_ref[...] = jnp.broadcast_to(b1_ref[...], acc_ref.shape)

    # Layer-1 partial product, accumulated over the K (= D) grid axis.
    # x is streamed fp32 from HBM and cast per tile (no extra HBM pass).
    acc_ref[...] += jnp.dot(x_ref[...].astype(jnp.bfloat16), w1_ref[...],
                            preferred_element_type=jnp.float32)

    @pl.when(k == pl.num_programs(1) - 1)
    def _finalize():
        h1 = jnp.maximum(acc_ref[...], 0.0)                      # ReLU(x@w1+b1)
        h2 = jnp.dot(h1.astype(jnp.bfloat16), w2_ref[...],
                     preferred_element_type=jnp.float32)
        h2 = jnp.maximum(h2 + b2_ref[...], 0.0)                  # ReLU
        # Final F -> 1 projection on the VPU/XLU (mul + lane reduce) instead
        # of a width-1 MXU GEMV.  b3 is added in the wrapper.
        out = jnp.sum(h2 * w3_ref[...], axis=-1, keepdims=True)
        o_ref[...] = out.astype(o_ref.dtype)


def _round_up(a, b):
    return (a + b - 1) // b * b


def _largest_aligned_divisor(d, cap):
    """Largest multiple-of-128 divisor of d that is <= cap (requires 128 | d)."""
    t = min((cap // 128) * 128, d)
    while t >= 128:
        if d % t == 0:
            return t
        t -= 128
    return 128


def _vmem_bytes(rt, tk, f):
    """Rough VMEM footprint (pipeline buffers + scratch + epilogue temps)."""
    return (2 * rt * tk * 4      # x tiles (fp32), double-buffered
            + 2 * tk * f * 2     # w1 tiles (bf16), double-buffered
            + f * f * 2          # w2 (bf16), single-buffered
            + 3 * f * 4          # b1, b2, w3 (fp32), single-buffered
            + rt * f * 4         # fp32 layer-1 accumulator scratch
            + 2 * rt * 128 * 4   # (padded) output blocks
            + 3 * rt * f * 4)    # h1/h2 temporaries + margin


def _tpu_vmem_capacity():
    try:
        return int(pltpu.get_tpu_info().vmem_capacity_bytes)
    except Exception:
        return 64 << 20          # conservative (v7x-sized) fallback


def count_head_forward(x_nchw, params, *, row_tile=None, k_tile=None):
    """x_nchw: (N, C, H, W) float32. Returns (N, 1) float32 count predictions."""
    w1, b1, w2, b2, w3, b3 = params
    n = x_nchw.shape[0]
    d = x_nchw.shape[1] * x_nchw.shape[2] * x_nchw.shape[3]
    f = w1.shape[1]
    assert w1.shape[0] == d, "param / input feature-dim mismatch"

    # ---- generation-aware budgets ---------------------------------------
    vmem_cap = _tpu_vmem_capacity()
    if vmem_cap <= (64 << 20):
        # v7x-like: 64 MiB VMEM/core, 2 TensorCores -> aim for exactly 2 row
        # tiles so each core runs one full w1 pass; keep scoped VMEM < 48 MiB.
        vmem_limit_cap = 48 << 20
        row_tile_cap = 512
        num_row_groups = 2
        k_tile_max = 3584
    else:
        # v5e / v6e: 128 MiB VMEM, single TensorCore -> one row tile covering
        # the whole padded batch so w1 is streamed from HBM exactly once.
        vmem_limit_cap = 100 << 20
        row_tile_cap = 1024
        num_row_groups = 1
        k_tile_max = 6272
    budget = (vmem_limit_cap * 7) // 8

    n_pad8 = _round_up(n, 8)

    # ---- row tile ---------------------------------------------------------
    if row_tile is None:
        rt = _round_up(-(-n_pad8 // num_row_groups), 8)
        rt = max(8, min(rt, row_tile_cap, n_pad8))
    else:
        rt = max(8, _round_up(min(int(row_tile), n_pad8), 8))

    # ---- K (= D) tile -------------------------------------------------------
    if k_tile is not None:
        tk = int(k_tile)
        assert d % tk == 0 and (tk == d or tk % 128 == 0), "bad k_tile"
        d_pad = d
    elif d <= k_tile_max:
        tk, d_pad = d, d                                  # single K step
    else:
        # Guard awkward D: pad the feature dim to a 128-aligned size so a
        # lane-aligned divisor always exists (worst case tk = 128).
        d_pad = d if d % 128 == 0 else _round_up(d, 128)
        tk = _largest_aligned_divisor(d_pad, k_tile_max)

    # Shrink tiles until the estimated VMEM footprint fits the budget.
    while _vmem_bytes(rt, tk, f) > budget:
        if tk > 128 and d_pad % 128 == 0:
            tk = _largest_aligned_divisor(d_pad, tk - 128)
        elif rt > 8:
            rt = max(8, _round_up(rt // 2, 8))
        else:
            break

    n_pad = _round_up(n, rt)
    num_k = d_pad // tk
    row_tiles = n_pad // rt

    # ---- operand prep -------------------------------------------------------
    # Flatten exactly like torch's x.view(N, -1) on contiguous NCHW.  x stays
    # fp32 (cast to bf16 per tile in-kernel); pad ragged batch / feature dims
    # with zeros (zero rows/cols don't change the matmul).
    x2d = x_nchw.reshape(n, d).astype(jnp.float32)
    if n_pad != n or d_pad != d:
        x2d = jnp.pad(x2d, ((0, n_pad - n), (0, d_pad - d)))

    w1b = w1.astype(jnp.bfloat16)
    if d_pad != d:
        w1b = jnp.pad(w1b, ((0, d_pad - d), (0, 0)))
    w2b = w2.astype(jnp.bfloat16)
    b1r = b1.reshape(1, f).astype(jnp.float32)
    b2r = b2.reshape(1, f).astype(jnp.float32)
    w3r = w3.reshape(1, f).astype(jnp.float32)   # (F,1) -> (1,F), same data

    grid = (row_tiles, num_k)
    invariant = pl.Buffered(1)   # single-buffer grid-invariant operands

    vmem_limit = int(min(max(2 * _vmem_bytes(rt, tk, f), 32 << 20),
                         vmem_limit_cap))

    cost = pl.CostEstimate(
        flops=2 * n_pad * (d_pad * f + f * f + f),
        transcendentals=0,
        bytes_accessed=(n_pad * d_pad * 4            # x stream (fp32)
                        + row_tiles * d_pad * f * 2  # w1, refetched per row tile
                        + f * f * 2                  # w2
                        + 3 * f * 4                  # b1, b2, w3
                        + n_pad * 4),                # output
    )

    out = pl.pallas_call(
        count_head_kernel,
        out_shape=jax.ShapeDtypeStruct((n_pad, 1), jnp.float32),
        grid_spec=pltpu.PrefetchScalarGridSpec(
            num_scalar_prefetch=0,
            grid=grid,
            in_specs=[
                pl.BlockSpec((rt, tk), lambda i, k: (i, k)),          # x
                pl.BlockSpec((tk, f), lambda i, k: (k, 0)),           # w1
                pl.BlockSpec((1, f), lambda i, k: (0, 0),
                             pipeline_mode=invariant),                # b1
                pl.BlockSpec((f, f), lambda i, k: (0, 0),
                             pipeline_mode=invariant),                # w2
                pl.BlockSpec((1, f), lambda i, k: (0, 0),
                             pipeline_mode=invariant),                # b2
                pl.BlockSpec((1, f), lambda i, k: (0, 0),
                             pipeline_mode=invariant),                # w3 row
            ],
            out_specs=pl.BlockSpec((rt, 1), lambda i, k: (i, 0)),
            scratch_shapes=[pltpu.VMEM((rt, f), jnp.float32)],
        ),
        compiler_params=pltpu.CompilerParams(
            dimension_semantics=("parallel", "arbitrary"),
            vmem_limit_bytes=vmem_limit),
        cost_estimate=cost,
    )(x2d, w1b, b1r, w2b, b2r, w3r)

    # Fold the final bias in the wrapper (avoids a padded (1,1) VMEM block)
    # and drop padding rows.
    return out[:n] + b3.reshape(1, 1)


def init_count_head_params(key, in_channels, roi_feat_size, fc_out_channels):
    """Deterministic synthetic init; weights stored as (in, out) for the kernel."""
    d = in_channels * roi_feat_size * roi_feat_size
    f = fc_out_channels
    k1, k2, k3, k4, k5, k6 = jax.random.split(key, 6)

    def lin(kw, kb, fan_in, fan_out):
        bound = 1.0 / jnp.sqrt(jnp.asarray(fan_in, jnp.float32))
        w = jax.random.uniform(kw, (fan_in, fan_out), jnp.float32, -bound, bound)
        b = jax.random.uniform(kb, (1, fan_out), jnp.float32, -bound, bound)
        return w, b

    w1, b1 = lin(k1, k2, d, f)
    w2, b2 = lin(k3, k4, f, f)
    w3, b3 = lin(k5, k6, f, 1)
    return (w1, b1, w2, b2, w3, b3)


def count_head_ref(x_nchw, params, compute_dtype=jnp.float32):
    """Pure-JAX reference. compute_dtype=bfloat16 mirrors the kernel's
    bf16-operand / fp32-accumulation arithmetic."""
    w1, b1, w2, b2, w3, b3 = params
    n = x_nchw.shape[0]
    f = w1.shape[1]
    x = x_nchw.reshape(n, -1).astype(compute_dtype)
    h1 = jnp.dot(x, w1.astype(compute_dtype),
                 preferred_element_type=jnp.float32)
    h1 = jnp.maximum(h1 + b1.reshape(1, f), 0.0)
    h2 = jnp.dot(h1.astype(compute_dtype), w2.astype(compute_dtype),
                 preferred_element_type=jnp.float32)
    h2 = jnp.maximum(h2 + b2.reshape(1, f), 0.0)
    out = jnp.sum(h2 * w3.reshape(1, f), axis=-1, keepdims=True)
    return out + b3.reshape(1, 1)


if __name__ == "__main__":
    key = jax.random.PRNGKey(0)

    # Config 1: ragged batch (N=20), C=8, R=4 -> D=128, F=128.
    # Exercises the auto (generation-aware) tiling path with a single K step.
    k1, k2, k3, k4 = jax.random.split(key, 4)
    N1, C1, R1, F1 = 20, 8, 4, 128
    x1 = jax.random.normal(k1, (N1, C1, R1, R1), dtype=jnp.float32)
    p1 = init_count_head_params(k2, in_channels=C1, roi_feat_size=R1,
                                fc_out_channels=F1)
    out1 = jax.block_until_ready(count_head_forward(x1, p1))
    assert out1.shape == (N1, 1)
    assert jnp.allclose(out1, count_head_ref(x1, p1, jnp.bfloat16),
                        atol=1e-3, rtol=1e-3), "mismatch vs bf16 reference (1)"
    assert jnp.allclose(out1, count_head_ref(x1, p1, jnp.float32),
                        atol=5e-2, rtol=5e-2), "mismatch vs fp32 reference (1)"

    # Config 2: N=48, C=16, R=4 -> D=256, F=128 with row_tile=16, k_tile=128.
    # Exercises the multi-row-tile grid and the K-tiled accumulator path
    # (b1 folded into the accumulator init).
    N2, C2, R2, F2 = 48, 16, 4, 128
    x2 = jax.random.normal(k3, (N2, C2, R2, R2), dtype=jnp.float32)
    p2 = init_count_head_params(k4, in_channels=C2, roi_feat_size=R2,
                                fc_out_channels=F2)
    out2 = jax.block_until_ready(
        count_head_forward(x2, p2, row_tile=16, k_tile=128))
    assert out2.shape == (N2, 1)
    assert jnp.allclose(out2, count_head_ref(x2, p2, jnp.bfloat16),
                        atol=1e-3, rtol=1e-3), "mismatch vs bf16 reference (2)"
    assert jnp.allclose(out2, count_head_ref(x2, p2, jnp.float32),
                        atol=5e-2, rtol=5e-2), "mismatch vs fp32 reference (2)"

    print("KERNEL_OK")
</pallas_src>

<mosaic_0001>
module attributes {stable_mosaic.version = 11 : i64} {
  func.func @count_head_kernel(%arg0: i32, %arg1: i32, %arg2: memref<16x128xf32, #tpu.memory_space<vmem>>, %arg3: memref<128x128xbf16, #tpu.memory_space<vmem>>, %arg4: memref<1x128xf32, #tpu.memory_space<vmem>>, %arg5: memref<128x128xbf16, #tpu.memory_space<vmem>>, %arg6: memref<1x128xf32, #tpu.memory_space<vmem>>, %arg7: memref<1x128xf32, #tpu.memory_space<vmem>>, %arg8: memref<16x1xf32, #tpu.memory_space<vmem>>, %arg9: memref<16x128xf32, #tpu.memory_space<vmem>>) attributes {dimension_semantics = [#tpu.dimension_semantics<parallel>, #tpu.dimension_semantics<arbitrary>], iteration_bounds = array<i64: 2, 1>, scalar_prefetch = 0 : i64, scratch_operands = 1 : i64, tpu.core_type = #tpu.core_type<tc>, window_params = [{transform_indices = @transform_0, window_bounds = array<i64: 16, 128>}, {transform_indices = @transform_1, window_bounds = array<i64: 128, 128>}, {pipeline_mode = #tpu.pipeline_mode<synchronous>, transform_indices = @transform_2, window_bounds = array<i64: 1, 128>}, {pipeline_mode = #tpu.pipeline_mode<synchronous>, transform_indices = @transform_3, window_bounds = array<i64: 128, 128>}, {pipeline_mode = #tpu.pipeline_mode<synchronous>, transform_indices = @transform_4, window_bounds = array<i64: 1, 128>}, {pipeline_mode = #tpu.pipeline_mode<synchronous>, transform_indices = @transform_5, window_bounds = array<i64: 1, 128>}, {transform_indices = @transform_6, window_bounds = array<i64: 16, 1>}]} {
    %c0_i32 = arith.constant 0 : i32
    %0 = arith.cmpi eq, %arg1, %c0_i32 : i32
    %1 = arith.extui %0 : i1 to i32
    %c0_i32_0 = arith.constant 0 : i32
    %2 = arith.cmpi ne, %1, %c0_i32_0 : i32
    scf.if %2 {
      %c0_10 = arith.constant 0 : index
      %c0_11 = arith.constant 0 : index
      %13 = vector.load %arg4[%c0_10, %c0_11] : memref<1x128xf32, #tpu.memory_space<vmem>>, vector<1x128xf32>
      %14 = vector.shape_cast %13 : vector<1x128xf32> to vector<1x128xf32>
      %15 = vector.broadcast %14 : vector<1x128xf32> to vector<16x128xf32>
      %c0_12 = arith.constant 0 : index
      %c0_13 = arith.constant 0 : index
      %16 = vector.load %arg9[%c0_12, %c0_13] : memref<16x128xf32, #tpu.memory_space<vmem>>, vector<16x128xf32>
      tpu.vector_store %arg9[%c0_12, %c0_13], %15 {strides = array<i32>} : memref<16x128xf32, #tpu.memory_space<vmem>>, vector<16x128xf32>,
    } else {
    }
    %c0 = arith.constant 0 : index
    %c0_1 = arith.constant 0 : index
    %3 = vector.load %arg9[%c0, %c0_1] : memref<16x128xf32, #tpu.memory_space<vmem>>, vector<16x128xf32>
    %c0_2 = arith.constant 0 : index
    %c0_3 = arith.constant 0 : index
    %4 = vector.load %arg2[%c0_2, %c0_3] : memref<16x128xf32, #tpu.memory_space<vmem>>, vector<16x128xf32>
    %5 = arith.truncf %4 : vector<16x128xf32> to vector<16x128xbf16>
    %c0_4 = arith.constant 0 : index
    %c0_5 = arith.constant 0 : index
    %6 = vector.load %arg3[%c0_4, %c0_5] : memref<128x128xbf16, #tpu.memory_space<vmem>>, vector<128x128xbf16>
    %cst = arith.constant dense<0.000000e+00> : vector<16x128xf32>
    %7 = tpu.matmul %5, %6, %cst {dimension_numbers = #tpu.dot_dimension_numbers<[1], [0], [0], [1], [0, 0, 1, 1], [], []>} : vector<16x128xbf16>, vector<128x128xbf16>, vector<16x128xf32> -> vector<16x128xf32>
    %8 = arith.addf %3, %7 : vector<16x128xf32>
    %c0_6 = arith.constant 0 : index
    %c0_7 = arith.constant 0 : index
    %9 = vector.load %arg9[%c0_6, %c0_7] : memref<16x128xf32, #tpu.memory_space<vmem>>, vector<16x128xf32>
    tpu.vector_store %arg9[%c0_6, %c0_7], %8 {strides = array<i32>} : memref<16x128xf32, #tpu.memory_space<vmem>>, vector<16x128xf32>,
    %c0_i32_8 = arith.constant 0 : i32
    %10 = arith.cmpi eq, %arg1, %c0_i32_8 : i32
    %11 = arith.extui %10 : i1 to i32
    %c0_i32_9 = arith.constant 0 : i32
    %12 = arith.cmpi ne, %11, %c0_i32_9 : i32
    scf.if %12 {
      %c0_10 = arith.constant 0 : index
      %c0_11 = arith.constant 0 : index
      %13 = vector.load %arg9[%c0_10, %c0_11] : memref<16x128xf32, #tpu.memory_space<vmem>>, vector<16x128xf32>
      %cst_12 = arith.constant 0.000000e+00 : f32
      %14 = vector.broadcast %cst_12 : f32 to vector<16x128xf32>
      %15 = arith.maximumf %13, %14 : vector<16x128xf32>
      %16 = arith.truncf %15 : vector<16x128xf32> to vector<16x128xbf16>
      %c0_13 = arith.constant 0 : index
      %c0_14 = arith.constant 0 : index
      %17 = vector.load %arg5[%c0_13, %c0_14] : memref<128x128xbf16, #tpu.memory_space<vmem>>, vector<128x128xbf16>
      %cst_15 = arith.constant dense<0.000000e+00> : vector<16x128xf32>
      %18 = tpu.matmul %16, %17, %cst_15 {dimension_numbers = #tpu.dot_dimension_numbers<[1], [0], [0], [1], [0, 0, 1, 1], [], []>} : vector<16x128xbf16>, vector<128x128xbf16>, vector<16x128xf32> -> vector<16x128xf32>
      %c0_16 = arith.constant 0 : index
      %c0_17 = arith.constant 0 : index
      %19 = vector.load %arg6[%c0_16, %c0_17] : memref<1x128xf32, #tpu.memory_space<vmem>>, vector<1x128xf32>
      %20 = vector.broadcast %19 : vector<1x128xf32> to vector<16x128xf32>
      %21 = arith.addf %18, %20 : vector<16x128xf32>
      %cst_18 = arith.constant 0.000000e+00 : f32
      %22 = vector.broadcast %cst_18 : f32 to vector<16x128xf32>
      %23 = arith.maximumf %21, %22 : vector<16x128xf32>
      %c0_19 = arith.constant 0 : index
      %c0_20 = arith.constant 0 : index
      %24 = vector.load %arg7[%c0_19, %c0_20] : memref<1x128xf32, #tpu.memory_space<vmem>>, vector<1x128xf32>
      %25 = vector.broadcast %24 : vector<1x128xf32> to vector<16x128xf32>
      %26 = arith.mulf %23, %25 : vector<16x128xf32>
      %cst_21 = arith.constant dense<0.000000e+00> : vector<16xf32>
      %27 = vector.multi_reduction <add>, %26, %cst_21 [1] : vector<16x128xf32> to vector<16xf32>
      %28 = vector.shape_cast %27 : vector<16xf32> to vector<16x1xf32>
      %c0_22 = arith.constant 0 : index
      %c0_23 = arith.constant 0 : index
      %29 = vector.load %arg8[%c0_22, %c0_23] : memref<16x1xf32, #tpu.memory_space<vmem>>, vector<16x1xf32>
      tpu.vector_store %arg8[%c0_22, %c0_23], %28 {strides = array<i32>} : memref<16x1xf32, #tpu.memory_space<vmem>>, vector<16x1xf32>,
    } else {
    }
    return
  }
  func.func @transform_0(%arg0: i32, %arg1: i32) -> (i32, i32) {
    %c0_i32 = arith.constant 0 : i32
    return %arg0, %arg1 : i32, i32
  }
  func.func @transform_1(%arg0: i32, %arg1: i32) -> (i32, i32) {
    %c0_i32 = arith.constant 0 : i32
    %c0_i32_0 = arith.constant 0 : i32
    return %arg1, %c0_i32 : i32, i32
  }
  func.func @transform_2(%arg0: i32, %arg1: i32) -> (i32, i32) {
    %c0_i32 = arith.constant 0 : i32
    %c0_i32_0 = arith.constant 0 : i32
    %c0_i32_1 = arith.constant 0 : i32
    return %c0_i32, %c0_i32_0 : i32, i32
  }
  func.func @transform_3(%arg0: i32, %arg1: i32) -> (i32, i32) {
    %c0_i32 = arith.constant 0 : i32
    %c0_i32_0 = arith.constant 0 : i32
    %c0_i32_1 = arith.constant 0 : i32
    return %c0_i32, %c0_i32_0 : i32, i32
  }
  func.func @transform_4(%arg0: i32, %arg1: i32) -> (i32, i32) {
    %c0_i32 = arith.constant 0 : i32
    %c0_i32_0 = arith.constant 0 : i32
    %c0_i32_1 = arith.constant 0 : i32
    return %c0_i32, %c0_i32_0 : i32, i32
  }
  func.func @transform_5(%arg0: i32, %arg1: i32) -> (i32, i32) {
    %c0_i32 = arith.constant 0 : i32
    %c0_i32_0 = arith.constant 0 : i32
    %c0_i32_1 = arith.constant 0 : i32
    return %c0_i32, %c0_i32_0 : i32, i32
  }
  func.func @transform_6(%arg0: i32, %arg1: i32) -> (i32, i32) {
    %c0_i32 = arith.constant 0 : i32
    %c0_i32_0 = arith.constant 0 : i32
    return %arg0, %c0_i32 : i32, i32
  }
}

</mosaic_0001>

<bundles_post_ra>
// kernel: tpu_custom_call.1
= control target key start
LH: loop header
LB: loop body
LE: loop exit
PB: predicated region body
PF: predicated region fallthrough
CT: control target
= control target key end

     0   :  { %11 = vsyncpa [#allocation4], 0  ;;  %s1279_s0 = inlined_call_operand.hbm [shape: f32[32,128], index: 0, kind: input, shape index: {}]   ;;  %s1280_s1 = inlined_call_operand.hbm [shape: bf16[128,128], index: 1, kind: input, shape index: {}]   ;;  %s1281_s2 = inlined_call_operand.vmem [shape: f32[1,128], index: 2, kind: input, shape index: {}]   ;;  %s1282_s3 = inlined_call_operand.hbm [shape: bf16[128,128], index: 3, kind: input, shape index: {}]   ;;  %s1283_s4 = inlined_call_operand.vmem [shape: f32[1,128], index: 4, kind: input, shape index: {}]   ;;  %s1284_s5 = inlined_call_operand.vmem [shape: f32[1,128], index: 5, kind: input, shape index: {}]   ;;  %s1285_s6 = inlined_call_operand.vmem [shape: f32[32,1], index: 6, kind: output, shape index: {}]  }
   0x1   :  { %13 = vsyncpa [#allocation4 + $0x1], 0 }
   0x2   :  { %14 = vsyncpa [#allocation6], 0  ;;  %s1071_s21 = smov 0   ;;  %s1073_s22 = smov 0  }
   0x3   :  { %s1075_s23 = smov 0   ;;  %s1077_s24 = smov 0  }
   0x4   :  { %s1079_s25 = smov 0   ;;  %s1081_s26 = smov 0  }
   0x5 LB: > { %s692_s27 = sadd.s32 4294967295, %s1025_s26   ;;  %p54_p0 = scmp.ne.s32.totalorder %s1009_s22, %s1005_s21  ;;  %s1025_s26 = sphi %s1081_s26, %s20_s26   ;;  %s1021_s25 = sphi %s1079_s25, %s1302_s25   ;;  %s1017_s24 = sphi %s1077_s24, %s1301_s24   ;;  %s1013_s23 = sphi %s1075_s23, %s1300_s23   ;;  %s1009_s22 = sphi %s1073_s22, %s1299_s22   ;;  %s1005_s21 = sphi %s1071_s21, %s1298_s21  }
   0x6   : > { %p1101_p1 = scmp.eq.s32.totalorder %s692_s27, 0  ;;  %p694_p2 = scmp.ge.s32.totalorder %s1025_s26, 1 }
   0x7   : > { %p201_p3 = scmp.lt.s32.totalorder %s1025_s26, 3  ;;  %s1027_s7 = smov [#allocation5]  }
   0x8   : > { %s1290_s28 = scalar_select %p1101_p1, 1, 0 }
   0x9   : > { %p1109_p4 = por %p1101_p1, %p54_p0  ;;  %p1113_p5 = pnand %p694_p2, %p201_p3 }
   0xa   : > { %s216_s8 = sshll.u32 %s1027_s7, 4  ;;  %s1028_s10 = smov [#allocation7]   ;;  %s217_s8 = int_to_ptr.vmem [resolvable:$true] %s216_s8 }
   0xb   : > { %s1291_s29 = scalar_select %p1109_p4, 1, 0 }
   0xc   : > { %s1292_s30 = scalar_select %p1113_p5, 1, 0 }
   0xd   : > { %p797_p6 = pneg %p1113_p5  ;;  %s232_s11 = sshll.u32 %s1028_s10, 4  ;;  %s1125_s11 = int_to_ptr.vmem [resolvable:$true] %s232_s11 }
   0xe   : > { %s885_s14 = scalar_lea.hbm %s1280_s1, 1024 }
   0xf   : > { %p1121_p7 = pnand %p797_p6, %p1101_p1  ;;  %p886_p8 = scmp.ne.s32.totalorder %s1280_s1, %s885_s14 }
  0x10   : > { %p892_p12 = scmp.lt.u32.totalorder %s885_s14, %s1280_s1 }
  0x11   : > { %p887_p9 = pneg %p1121_p7 }
  0x13   : > { %p888_p10 = pnand %p887_p9, %p886_p8 }
  0x15   : > { %p889_p11 = pneg %p888_p10 }
  0x17   : > { %p894_p13 = pnand %p892_p12, %p889_p11 }
  0x19   : > { %897 = shalt.err (!%p894_p13)
}
  0x1a   : > { %s898_s19 = scalar_lea.vmem %s217_s8, 1024  ;;  %p906_p6 = scmp.lt.s32.totalorder %s217_s8, %s217_s8 }
  0x1b   : > { %p899_p0 = scmp.ne.s32.totalorder %s217_s8, %s898_s19  ;;  %p907_p1 = scmp.lt.s32.totalorder %s898_s19, %s898_s19 }
  0x1d   : > { %p901_p2 = pnand %p899_p0, %p887_p9  ;;  %p908_p4 = por %p907_p1, %p906_p6 }
  0x1f   : > { %p902_p3 = pneg %p901_p2 }
  0x21   : > { %p909_p5 = pnand %p908_p4, %p902_p3 }
  0x23   : > { %912 = shalt.err (!%p909_p5)
}
  0x24   : > { %s1029_s20 = smov 64   ;;  %s1030_s21 = smov 4  }
  0x25   : > { %800 = dma.hbm_to_vmem [thread:$0]  (!%p1121_p7), %s1280_s1, 1024, %s217_s8, [#allocation6], %s1029_s20, %s1029_s20, %s1030_s21  }
  0x26   : > { %s913_s13 = scalar_lea.hbm %s1282_s3, 1024 }
  0x27   : > { %p914_p8 = scmp.ne.s32.totalorder %s1282_s3, %s913_s13  ;;  %p920_p5 = scmp.lt.u32.totalorder %s913_s13, %s1282_s3 }
  0x29   : > { %p916_p1 = pnand %p914_p8, %p887_p9 }
  0x2b   : > { %p917_p4 = pneg %p916_p1 }
  0x2d   : > { %p922_p10 = pnand %p920_p5, %p917_p4 }
  0x2f   : > { %925 = shalt.err (!%p922_p10)
}
  0x30   : > { %s926_s8 = scalar_lea.vmem %s1125_s11, 1024  ;;  %p934_p0 = scmp.lt.s32.totalorder %s1125_s11, %s1125_s11 }
  0x31   : > { %p927_p11 = scmp.ne.s32.totalorder %s1125_s11, %s926_s8  ;;  %p935_p2 = scmp.lt.s32.totalorder %s926_s8, %s926_s8 }
  0x33   : > { %p929_p12 = pnand %p927_p11, %p887_p9  ;;  %p936_p3 = por %p935_p2, %p934_p0 }
  0x35   : > { %p930_p13 = pneg %p929_p12 }
  0x37   : > { %p937_p6 = pnand %p936_p3, %p930_p13 }
  0x39   : > { %940 = shalt.err (!%p937_p6)
}
  0x3a   : > { %803 = dma.hbm_to_vmem [thread:$0]  (!%p1121_p7), %s1282_s3, 1024, %s1125_s11, [#allocation6], %s1029_s20, %s1029_s20, %s1030_s21  }
  0x3b   : > { %s32_s27 = sadd.s32 1, %s1021_s25  ;;  %s41_s7 = sadd.s32 1, %s1013_s23 }
  0x3c   : > { %p34_p9 = scmp.ge.s32.totalorder %s32_s27, 2  ;;  %p48_p8 = scmp.ne.s32.totalorder %s1013_s23, %s1009_s22 }
  0x3d   : > { %p49_p1 = scmp.eq.s32.totalorder %s1025_s26, 0  ;;  %p810_p4 = scmp.lt.s32.totalorder %s1025_s26, 2 }
  0x3e   : > { %s1304_s27 = smov (%p34_p9, %s32_s27), 0  ;;  %s252_s9 = sand.u32 1, %s1013_s23  }
  0x3f   : > { %p50_p5 = por %p49_p1, %p48_p8  ;;  %s36_s10 = ssub.s32 %s1021_s25, %s1304_s27 }
  0x40   : > { %p39_p10 = scmp.eq.s32.totalorder %s36_s10, 0  ;;  %s698_s12 = sshll.u32 %s252_s9, 4 }
  0x41   : > { %s728_s13 = sshll.u32 %s1021_s25, 8  ;;  %s256_s21 = scalar_lea.vmem [#allocation3], %s698_s12 }
  0x42   : > { %s1187_s14 = scalar_select %p39_p10, %s1013_s23, %s41_s7  }
  0x43   : > { %s1192_s20 = scalar_lea.hbm %s1279_s0, %s728_s13  ;;  %s264_s16 = sshll.u32 %s256_s21, 4  ;;  %s1194_s16 = int_to_ptr.vmem [resolvable:$true] %s264_s16 }
  0x44   : > { %p1198_p7 = pnand %p810_p4, %p50_p5  ;;  %s1202_s8 = scalar_lea.sflag [#allocation4], %s252_s9 }
  0x45   : > { %s941_s18 = scalar_lea.hbm %s1192_s20, 256  ;;  %s946_s10 = scalar_lea.hbm %s1279_s0, 512 }
  0x46   : > { %p942_p11 = scmp.ne.s32.totalorder %s1192_s20, %s941_s18  ;;  %p943_p12 = pneg %p1198_p7 }
  0x47   : > { %p947_p2 = scmp.lt.u32.totalorder %s1192_s20, %s1279_s0  ;;  %p948_p3 = scmp.lt.u32.totalorder %s946_s10, %s941_s18 }
  0x48   : > { %p944_p13 = pnand %p943_p12, %p942_p11  ;;  %p950_p9 = scmp.lt.u32.totalorder %s941_s18, %s1192_s20 }
  0x49   : > { %p949_p6 = por %p948_p3, %p947_p2 }
  0x4a   : > { %p945_p0 = pneg %p944_p13 }
  0x4b   : > { %p951_p8 = por %p950_p9, %p949_p6 }
  0x4d   : > { %p952_p1 = pnand %p951_p8, %p945_p0 }
  0x4f   : > { %955 = shalt.err (!%p952_p1)
}
  0x50   : > { %s956_s9 = scalar_lea.vmem %s1194_s16, 256  ;;  %s1031_s15 = smov [#allocation3]  }
  0x51   : > { %p957_p4 = scmp.ne.s32.totalorder %s1194_s16, %s956_s9  ;;  %s961_s11 = sshll.u32 %s1031_s15, 4  ;;  %s962_s11 = int_to_ptr.vmem [resolvable:$false] %s961_s11 }
  0x52   : > { %s963_s21 = scalar_lea.vmem %s962_s11, 512  ;;  %p964_p11 = scmp.lt.s32.totalorder %s1194_s16, %s962_s11 }
  0x53   : > { %p959_p5 = pnand %p957_p4, %p943_p12  ;;  %p965_p13 = scmp.lt.s32.totalorder %s963_s21, %s956_s9 }
  0x55   : > { %p960_p10 = pneg %p959_p5  ;;  %p966_p2 = por %p965_p13, %p964_p11 }
  0x57   : > { %p967_p3 = pnand %p966_p2, %p960_p10 }
  0x59   : > { %970 = shalt.err (!%p967_p3)
}
  0x5a   : > { %s1032_s18 = smov 128   ;;  %s1033_s19 = smov 8  }
  0x5b   : > { %807 = dma.hbm_to_vmem [thread:$0]  (!%p1198_p7), %s1192_s20, 256, %s1194_s16, %s1202_s8, %s1032_s18, %s1032_s18, %s1033_s19  }
  0x5c   : > { %p1295_p12 = scmp.ne.s32.totalorder %s1292_s30, 0 }
  0x5d   : > { %s278_s7 = sand.u32 (!%p1295_p12), 1, %s1009_s22   ;;  %p1296_p0 = scmp.ne.s32.totalorder (!%p1295_p12), %s1291_s29, 0 }
  0x5e   : > { %276 = sbr.rel (%p1295_p12) target bundleno = 724 (0x2d4), region = 44  ;;  %s1233_s10 = sshll.u32 (!%p1295_p12), %s278_s7, 4 }
  0x5f   : > { %s279_s12 = scalar_lea.sflag (!%p1295_p12), [#allocation4], %s278_s7  ;;  %s282_s13 = scalar_lea.vmem (!%p1295_p12), [#allocation3], %s1233_s10 }
  0x65   : > { %996 = dma.done.wait (%p1296_p0), %s279_s12, 256  }
  0x66   : > { %998 = vsyncadd (%p1296_p0), %s279_s12, 4294967040  ;;  %p1297_p6 = scmp.ne.s32.totalorder %s1290_s28, 0 }
  0x68   : > { %1000 = dma.done.wait (%p1297_p6), [#allocation6], 2048  }
  0x69   : > { %1002 = vsyncadd (%p1297_p6), [#allocation6], 4294965248  ;;  %v1034_v0 = vmov 0.0   ;;  %vm1035_vm0 = vmmov 0   ;;  %v869_v1 = vld [vmem:[#allocation5] sm:$0xff]   ;;  %v870_v2 = vld [vmem:[#allocation5 + $0x8] sm:$0xff]  }
  0x6a   : > { %747 = vmatprep.subr.bf16.mxu0 %v1034_v0  ;;  %763 = vmatprep.mubr.msk.bf16.mxu0 %vm1035_vm0, %v1034_v0  ;;  %v871_v3 = vld [vmem:[#allocation5 + $0x10] sm:$0xff]   ;;  %v877_v4 = vld [vmem:[#allocation7] sm:$0xff]   ;;  %v872_v5 = vld [vmem:[#allocation5 + $0x18] sm:$0xff]   ;;  %s705_s8 = sshll.u32 %s1017_s24, 1  ;;  %vm590_vm1 = vcmask 7168  }
  0x6b   : > { %767 = vmatprep.subr.bf16.mxu1 %v1034_v0  ;;  %783 = vmatprep.mubr.msk.bf16.mxu1 %vm1035_vm0, %v1034_v0  ;;  %v878_v6 = vld [vmem:[#allocation7 + $0x8] sm:$0xff]   ;;  %v873_v7 = vld [vmem:[#allocation5 + $0x20] sm:$0xff]   ;;  %v879_v8 = vld [vmem:[#allocation7 + $0x10] sm:$0xff]   ;;  %p322_p7 = scmp.lt.s32.totalorder %s705_s8, 3 }
  0x6c   : > { %748 = vmatpush3.bf16.msra.mxu0 %v869_v1  ;;  %768 = vmatpush3.bf16.msra.mxu1 %v877_v4  ;;  %v874_v9 = vld [vmem:[#allocation5 + $0x28] sm:$0xff]   ;;  %v880_v10 = vld [vmem:[#allocation7 + $0x18] sm:$0xff]   ;;  %v875_v11 = vld [vmem:[#allocation5 + $0x30] sm:$0xff]  }
  0x6d   : > { %749 = vmatprep.subr.bf16.mxu0 %v1034_v0  ;;  %769 = vmatprep.subr.bf16.mxu1 %v1034_v0  ;;  %v881_v12 = vld [vmem:[#allocation7 + $0x20] sm:$0xff]   ;;  %v876_v13 = vld [vmem:[#allocation5 + $0x38] sm:$0xff]   ;;  %v882_v16 = vld [vmem:[#allocation7 + $0x28] sm:$0xff]   ;;  %s1306_s8 = smov (!%p322_p7, %s705_s8), 3 }
  0x6e   : > { %v343_v14 = vld [vmem:[%s282_s13] sm:$0xff]  ;;  %v344_v15 = vld [vmem:[%s282_s13 + $0x8] sm:$0xff]  ;;  %s706_s9 = sshll.u32 %s1306_s8, 3 }
  0x6f   : > { %v345_v17 = vpack.c.bf16 %v344_v15, %v343_v14  ;;  %v883_v18 = vld [vmem:[#allocation7 + $0x30] sm:$0xff]   ;;  %v884_v19 = vld [vmem:[#allocation7 + $0x38] sm:$0xff]   ;;  %v707_v20 = vld [vmem:[%s1281_s2] ss:$0 sm:$0xff]  ;;  %s325_s21 = scalar_lea.vmem %s1285_s6, %s706_s9 }
  0x70   : > { %750 = vmatpush3.bf16.msra.mxu0 %v870_v2  ;;  %770 = vmatpush3.bf16.msra.mxu1 %v878_v6  ;;  %v716_v30 = vld [vmem:[%s1283_s4] ss:$0 sm:$0xff] }
  0x71   : > { %751 = vmatprep.subr.bf16.mxu0 %v1034_v0  ;;  %771 = vmatprep.subr.bf16.mxu1 %v1034_v0  ;;  %v725_v35 = vld [vmem:[%s1284_s5] ss:$0 sm:$0xff] }
  0x74   : > { %752 = vmatpush3.bf16.msra.mxu0 %v871_v3  ;;  %772 = vmatpush3.bf16.msra.mxu1 %v879_v8 }
  0x75   : > { %753 = vmatprep.subr.bf16.mxu0 %v1034_v0  ;;  %773 = vmatprep.subr.bf16.mxu1 %v1034_v0 }
  0x78   : > { %754 = vmatpush3.bf16.msra.mxu0 %v872_v5  ;;  %774 = vmatpush3.bf16.msra.mxu1 %v880_v10 }
  0x79   : > { %755 = vmatprep.subr.bf16.mxu0 %v1034_v0  ;;  %775 = vmatprep.subr.bf16.mxu1 %v1034_v0 }
  0x7c   : > { %756 = vmatpush3.bf16.msra.mxu0 %v873_v7  ;;  %776 = vmatpush3.bf16.msra.mxu1 %v881_v12 }
  0x7d   : > { %757 = vmatprep.subr.bf16.mxu0 %v1034_v0  ;;  %777 = vmatprep.subr.bf16.mxu1 %v1034_v0 }
  0x80   : > { %758 = vmatpush3.bf16.msra.mxu0 %v874_v9  ;;  %778 = vmatpush3.bf16.msra.mxu1 %v882_v16 }
  0x81   : > { %759 = vmatprep.subr.bf16.mxu0 %v1034_v0  ;;  %779 = vmatprep.subr.bf16.mxu1 %v1034_v0 }
  0x84   : > { %760 = vmatpush3.bf16.msra.mxu0 %v875_v11  ;;  %780 = vmatpush3.bf16.msra.mxu1 %v883_v18 }
  0x85   : > { %761 = vmatprep.subr.bf16.mxu0 %v1034_v0  ;;  %781 = vmatprep.subr.bf16.mxu1 %v1034_v0 }
  0x88   : > { %762 = vmatpush3.bf16.msra.mxu0 %v876_v13  ;;  %782 = vmatpush3.bf16.msra.mxu1 %v884_v19 }
  0x8b   : > { %764 = vmatmul.mubr.bf16.vlgmr.msra.gmra.mrb[0].mxu0 %v345_v17 }
 0x15e   : > { %v444_v21 = vpop.f32.mrb[0].mxu0 }
 0x15f   : > { %v451_v22 = vadd.f32 %v707_v20, %v444_v21  ;;  %v765_v23 = vpop.f32.mrb[1].mxu0 }
 0x160   : > { %v447_v24 = vpop.f32.mrb[2].mxu0 }
 0x161   : > { %v452_v25 = vadd.f32 %v707_v20, %v447_v24  ;;  %v766_v26 = vpop.f32.mrb[3].mxu0  ;;  %v460_v27 = vmax.f32 %v451_v22, 0.0 }
 0x163   : > { %v461_v28 = vmax.f32 %v452_v25, 0.0 }
 0x165   : > { %v462_v29 = vpack.c.bf16 %v461_v28, %v460_v27 }
 0x167   : > { %784 = vmatmul.mubr.bf16.vlgmr.msra.gmra.mrb[0].mxu1 %v462_v29 }
 0x23a   : > { %v568_v31 = vpop.f32.mrb[0].mxu1 }
 0x23b   : > { %v569_v32 = vadd.f32 %v716_v30, %v568_v31  ;;  %v785_v33 = vpop.f32.mrb[1].mxu1 }
 0x23c   : > { %v571_v34 = vpop.f32.mrb[2].mxu1 }
 0x23d   : > { %v575_v36 = vmax.f32 %v569_v32, 0.0  ;;  %v572_v37 = vadd.f32 %v716_v30, %v571_v34  ;;  %v786_v38 = vpop.f32.mrb[3].mxu1 }
 0x23f   : > { %v576_v39 = vmax.f32 %v572_v37, 0.0  ;;  %v584_v40 = vmul.f32 %v725_v35, %v575_v36 }
 0x241   : > { %586 = vadd.xlane.f32.xlu0 %v584_v40  ;;  %v585_v41 = vmul.f32 %v725_v35, %v576_v39 }
 0x245   : > { %588 = vadd.xlane.f32.xlu0 %v585_v41 }
 0x2ce   : > { %v587_v42 = vpop.xlane.xlu0 %586 }
 0x2cf   : > { %591 = vst.msk [vmem:[%s325_s21] sm:$0xff] %vm590_vm1, %v587_v42 }
 0x2d2   : > { %v589_v43 = vpop.xlane.xlu0 %588 }
 0x2d3   : > { %592 = vst.msk [vmem:[%s325_s21 + $0x8] sm:$0xff] %vm590_vm1, %v589_v43 }
 0x2d4 PF: > { %s20_s26 = sadd.s32 1, %s1025_s26   ;;  %s1298_s21 = smov %s1009_s22 }
 0x2d5   : > { %p17_p9 = scmp.ge.s32.totalorder %s20_s26, 4   ;;  %s1299_s22 = smov %s1013_s23 }
 0x2d6   : > { %s1300_s23 = smov %s1187_s14  ;;  %s1301_s24 = smov %s1021_s25 }
 0x2d7   : > { %s1302_s25 = smov %s1304_s27  ;;  %19 = sbr.rel (!%p17_p9) target bundleno = 5 (0x5), region = 101 }
 0x2de   :  { %615 = vsyncpa [#allocation4], 1 }
 0x2df   :  { %617 = vsyncpa [#allocation4 + $0x1], 1 }
 0x2e0   :  { %618 = vsyncpa [#allocation6], 1 }

</bundles_post_ra>
